<compile_context>
chip_gen: v5e
topology: v5e:2x2
jax: 0.10.0
libtpu: 0.0.40
codegen_flags: <defaults>
</compile_context>

<pallas_src>
import functools

import jax
import jax.numpy as jnp
from jax.experimental import pallas as pl
from jax.experimental.pallas import tpu as pltpu

HIDDEN = 64        # logical hidden size of the PyTorch module
HIDDEN_PAD = 128   # lane-dense padded hidden size used inside the kernel
OUT_PAD = 128      # lane-dense padded output size used inside the kernel


def _round_up(x, m):
    return (x + m - 1) // m * m


def _default_use_bf16():
    """bf16 operands win on v6e/v7x (bf16 VPU, 2x256 MXU); keep f32 on v5e/older."""
    try:
        kind = jax.devices()[0].device_kind.lower()
    except Exception:
        return False
    return any(tag in kind for tag in ("v6", "v7", "7x"))


# ---------------------------------------------------------------------------
# Kernel: one batch tile (TM, in_p) -> (TM, OUT_PAD)
# ---------------------------------------------------------------------------
def dqn_kernel(x_ref, w_ref, b_ref, o_ref, *, in_p, hid):
    """w_ref rows: [0, in_p) = W1, [in_p, in_p+hid) = W2, [in_p+hid, in_p+2*hid) = W3,
    all zero-padded to `hid` (=128) lanes. b_ref is (3, hid) f32: rows 0/1/2 = b1/b2/b3."""
    x = x_ref[...]                                   # (TM, in_p)
    wdt = w_ref.dtype

    w1 = w_ref[0:in_p, :]                            # static slices -> zero-cost views
    w2 = w_ref[in_p:in_p + hid, :]
    w3 = w_ref[in_p + hid:in_p + 2 * hid, :]

    b1 = b_ref[0:1, :]
    b2 = b_ref[1:2, :]
    b3 = b_ref[2:3, :]

    # Layer 1: Linear + ReLU (f32 accumulate, f32 epilogue).
    h = jnp.dot(x, w1, preferred_element_type=jnp.float32)
    h = jnp.maximum(h + b1, 0.0)
    # Layer 2: Linear + ReLU.
    h = jnp.dot(h.astype(wdt), w2, preferred_element_type=jnp.float32)
    h = jnp.maximum(h + b2, 0.0)
    # Layer 3: Linear (no activation). Lane-dense (TM, 128) store.
    out = jnp.dot(h.astype(wdt), w3, preferred_element_type=jnp.float32)
    o_ref[...] = (out + b3).astype(o_ref.dtype)


# ---------------------------------------------------------------------------
# Parameter packing (do this ONCE, outside the per-step hot path).
# ---------------------------------------------------------------------------
def pack_dqn_params(params, *, use_bf16=None):
    """Pack + zero-pad w1/b1/w2/b2/w3/b3 into one weight blob and one bias blob.

    Weights are stored (in_features, out_features). Exact: padded hidden columns
    are zero through the ReLUs; padded rows multiply zeros."""
    if use_bf16 is None:
        use_bf16 = _default_use_bf16()

    w1, b1, w2, b2, w3, b3 = (params[k] for k in ("w1", "b1", "w2", "b2", "w3", "b3"))
    in_features, hid = w1.shape
    out_features = w3.shape[1]
    assert hid <= HIDDEN_PAD, f"hidden={hid} exceeds HIDDEN_PAD={HIDDEN_PAD}"
    assert w2.shape == (hid, hid)
    assert out_features <= OUT_PAD, f"output={out_features} exceeds OUT_PAD={OUT_PAD}"

    wdtype = jnp.bfloat16 if use_bf16 else jnp.float32
    # Align W2/W3 section starts to the dtype's sublane tile (bf16 packs 2 rows/sublane)
    # so the in-kernel weight slices never straddle a (sublane,128) tile boundary.
    row_align = 16 if use_bf16 else 8
    in_p = _round_up(max(in_features, row_align), row_align)
    H = HIDDEN_PAD

    wblob = jnp.zeros((in_p + 2 * H, H), wdtype)
    wblob = wblob.at[0:in_features, 0:hid].set(w1.astype(wdtype))
    wblob = wblob.at[in_p:in_p + hid, 0:hid].set(w2.astype(wdtype))
    wblob = wblob.at[in_p + H:in_p + H + hid, 0:out_features].set(w3.astype(wdtype))

    bblob = jnp.zeros((3, H), jnp.float32)
    bblob = bblob.at[0, 0:hid].set(b1.reshape(-1).astype(jnp.float32))
    bblob = bblob.at[1, 0:hid].set(b2.reshape(-1).astype(jnp.float32))
    bblob = bblob.at[2, 0:out_features].set(b3.reshape(-1).astype(jnp.float32))

    return {
        "wblob": wblob,
        "bblob": bblob,
        "in_features": in_features,
        "in_p": in_p,
        "out_features": out_features,
        "wdtype": wdtype,
        "row_align": row_align,
    }


# ---------------------------------------------------------------------------
# Forward wrapper.
# ---------------------------------------------------------------------------
def dqn_forward(x, packed_or_params, *, block_m=2048, return_padded=False, use_bf16=None):
    """x: (B, input_size). Prefer passing pre-packed params (pack_dqn_params);
    a raw {"w1",...,"b3"} dict is also accepted (packed on the fly — slow path)."""
    packed = packed_or_params
    if "wblob" not in packed:
        packed = pack_dqn_params(packed, use_bf16=use_bf16)

    wblob, bblob = packed["wblob"], packed["bblob"]
    in_features, in_p = packed["in_features"], packed["in_p"]
    out_features = packed["out_features"]
    wdtype = packed["wdtype"]
    row_align = packed["row_align"]
    itemsize = jnp.dtype(wdtype).itemsize

    assert x.ndim == 2 and x.shape[1] == in_features
    B = x.shape[0]
    H = HIDDEN_PAD

    # Batch tile: as large as block_m allows (grid-step overhead dominates this tiny
    # kernel), sublane-tile aligned, but capped so the grid has >=2 "parallel" tiles
    # when the batch allows it (both v7x TensorCores; harmless on 1-TC chips).
    block_m = _round_up(max(block_m, row_align), row_align)
    b_al = _round_up(B, row_align)
    if b_al >= 2 * row_align:
        tm = max(row_align, min(block_m, _round_up(pl.cdiv(b_al, 2), row_align)))
    else:
        tm = row_align
    B_p = _round_up(B, tm)
    grid = (B_p // tm,)

    # Skip the wrapper pad/cast copy when x already matches the kernel layout.
    if B == B_p and in_features == in_p and x.dtype == wdtype:
        x_p = x
    else:
        x_p = jnp.zeros((B_p, in_p), wdtype).at[:B, :in_features].set(x.astype(wdtype))

    out_dtype = wdtype  # bf16 store on the fast path halves the padded writeback
    flops = 2 * B_p * (in_p * H + H * H + H * H)
    bytes_accessed = (B_p * in_p * itemsize                       # x in
                      + wblob.size * itemsize                     # resident weights
                      + bblob.size * 4                            # resident biases
                      + B_p * OUT_PAD * jnp.dtype(out_dtype).itemsize)  # out

    kernel = functools.partial(dqn_kernel, in_p=in_p, hid=H)

    out = pl.pallas_call(
        kernel,
        out_shape=jax.ShapeDtypeStruct((B_p, OUT_PAD), out_dtype),
        grid_spec=pltpu.PrefetchScalarGridSpec(
            num_scalar_prefetch=0,
            grid=grid,
            in_specs=[
                pl.BlockSpec((tm, in_p), lambda i: (i, 0)),           # streamed x tile
                pl.BlockSpec(wblob.shape, lambda i: (0, 0)),          # resident weights
                pl.BlockSpec(bblob.shape, lambda i: (0, 0)),          # resident biases
            ],
            out_specs=pl.BlockSpec((tm, OUT_PAD), lambda i: (i, 0)),  # lane-dense out
        ),
        compiler_params=pltpu.CompilerParams(
            dimension_semantics=("parallel",)),
        cost_estimate=pl.CostEstimate(
            flops=flops, transcendentals=0, bytes_accessed=bytes_accessed),
    )(x_p, wblob, bblob)

    if return_padded:
        # Consumers that can read the padded buffer (e.g. fuse argmax downstream)
        # avoid the slice round trip entirely; valid Q-values at [:B, :out_features].
        return out
    return out[:B, :out_features]


# ---------------------------------------------------------------------------
# Init / reference (match nn.Linear defaults; weights stored (in, out)).
# ---------------------------------------------------------------------------
def init_dqn_params(key, input_size, output_size):
    ks = jax.random.split(key, 6)

    def linear(kw, kb, fan_in, fan_out):
        bound = 1.0 / jnp.sqrt(fan_in)
        w = jax.random.uniform(kw, (fan_in, fan_out), jnp.float32, -bound, bound)
        b = jax.random.uniform(kb, (1, fan_out), jnp.float32, -bound, bound)
        return w, b

    w1, b1 = linear(ks[0], ks[1], input_size, HIDDEN)
    w2, b2 = linear(ks[2], ks[3], HIDDEN, HIDDEN)
    w3, b3 = linear(ks[4], ks[5], HIDDEN, output_size)
    return {"w1": w1, "b1": b1, "w2": w2, "b2": b2, "w3": w3, "b3": b3}


def dqn_reference(x, params):
    h = jnp.maximum(x @ params["w1"] + params["b1"], 0.0)
    h = jnp.maximum(h @ params["w2"] + params["b2"], 0.0)
    return h @ params["w3"] + params["b3"]


if __name__ == "__main__":
    key = jax.random.PRNGKey(0)
    k_x, k_x2, k_x3, k_p = jax.random.split(key, 4)

    batch, input_size, output_size = 8, 16, 4
    x = jax.random.normal(k_x, (batch, input_size), jnp.float32)
    params = init_dqn_params(k_p, input_size, output_size)

    # --- f32 path, params packed ONCE (hoisted out of the hot path): exact ---
    packed_f32 = pack_dqn_params(params, use_bf16=False)
    out = dqn_forward(x, packed_f32)
    jax.block_until_ready(out)
    ref = dqn_reference(x, params)
    assert out.shape == (batch, output_size)
    assert jnp.allclose(out, ref, atol=1e-5, rtol=1e-5), "f32 mismatch vs reference"

    # --- multi-tile grid (>=2 parallel tiles for v7x), ragged batch padded ---
    x_big = jax.random.normal(k_x2, (300, input_size), jnp.float32)
    out_big = dqn_forward(x_big, packed_f32)
    jax.block_until_ready(out_big)
    ref_big = dqn_reference(x_big, params)
    assert out_big.shape == (300, output_size)
    assert jnp.allclose(out_big, ref_big, atol=1e-5, rtol=1e-5), "tiled mismatch"

    # --- no-copy input path (layout already matches) + padded-output return ---
    x_even = jax.random.normal(k_x3, (256, input_size), jnp.float32)
    out_pad = dqn_forward(x_even, packed_f32, return_padded=True)
    jax.block_until_ready(out_pad)
    ref_even = dqn_reference(x_even, params)
    assert out_pad.shape[1] == OUT_PAD
    assert jnp.allclose(out_pad[:256, :output_size], ref_even, atol=1e-5, rtol=1e-5), \
        "padded-output mismatch"

    # --- bf16 operand path (default fast path on v6e/v7x; f32 accumulate) ---
    packed_bf16 = pack_dqn_params(params, use_bf16=True)
    out_bf16 = dqn_forward(x_big, packed_bf16)
    jax.block_until_ready(out_bf16)
    assert jnp.allclose(out_bf16.astype(jnp.float32), ref_big, atol=5e-2, rtol=5e-2), \
        "bf16 mismatch"

    print("KERNEL_OK")
</pallas_src>

<mosaic_0001>
module attributes {stable_mosaic.version = 11 : i64} {
  func.func @dqn_kernel(%arg0: i32, %arg1: memref<8x16xf32, #tpu.memory_space<vmem>>, %arg2: memref<272x128xf32, #tpu.memory_space<vmem>>, %arg3: memref<3x128xf32, #tpu.memory_space<vmem>>, %arg4: memref<8x128xf32, #tpu.memory_space<vmem>>) attributes {dimension_semantics = [#tpu.dimension_semantics<parallel>], iteration_bounds = array<i64: 1>, scalar_prefetch = 0 : i64, scratch_operands = 0 : i64, tpu.core_type = #tpu.core_type<tc>, window_params = [{transform_indices = @transform_0, window_bounds = array<i64: 8, 16>}, {pipeline_mode = #tpu.pipeline_mode<synchronous>, transform_indices = @transform_1, window_bounds = array<i64: 272, 128>}, {pipeline_mode = #tpu.pipeline_mode<synchronous>, transform_indices = @transform_2, window_bounds = array<i64: 3, 128>}, {transform_indices = @transform_3, window_bounds = array<i64: 8, 128>}]} {
    %c0 = arith.constant 0 : index
    %c0_0 = arith.constant 0 : index
    %0 = vector.load %arg1[%c0, %c0_0] : memref<8x16xf32, #tpu.memory_space<vmem>>, vector<8x16xf32>
    %c0_1 = arith.constant 0 : index
    %c0_2 = arith.constant 0 : index
    %1 = vector.load %arg2[%c0_1, %c0_2] : memref<272x128xf32, #tpu.memory_space<vmem>>, vector<16x128xf32>
    %c16 = arith.constant 16 : index
    %c0_3 = arith.constant 0 : index
    %2 = vector.load %arg2[%c16, %c0_3] : memref<272x128xf32, #tpu.memory_space<vmem>>, vector<128x128xf32>
    %c144 = arith.constant 144 : index
    %c0_4 = arith.constant 0 : index
    %3 = vector.load %arg2[%c144, %c0_4] : memref<272x128xf32, #tpu.memory_space<vmem>>, vector<128x128xf32>
    %c0_5 = arith.constant 0 : index
    %c0_6 = arith.constant 0 : index
    %4 = vector.load %arg3[%c0_5, %c0_6] : memref<3x128xf32, #tpu.memory_space<vmem>>, vector<1x128xf32>
    %c1 = arith.constant 1 : index
    %c0_7 = arith.constant 0 : index
    %5 = vector.load %arg3[%c1, %c0_7] : memref<3x128xf32, #tpu.memory_space<vmem>>, vector<1x128xf32>
    %c2 = arith.constant 2 : index
    %c0_8 = arith.constant 0 : index
    %6 = vector.load %arg3[%c2, %c0_8] : memref<3x128xf32, #tpu.memory_space<vmem>>, vector<1x128xf32>
    %cst = arith.constant dense<0.000000e+00> : vector<8x128xf32>
    %7 = tpu.matmul %0, %1, %cst {dimension_numbers = #tpu.dot_dimension_numbers<[1], [0], [0], [1], [0, 0, 1, 1], [], []>} : vector<8x16xf32>, vector<16x128xf32>, vector<8x128xf32> -> vector<8x128xf32>
    %8 = vector.broadcast %4 : vector<1x128xf32> to vector<8x128xf32>
    %9 = arith.addf %7, %8 : vector<8x128xf32>
    %cst_9 = arith.constant 0.000000e+00 : f32
    %10 = vector.broadcast %cst_9 : f32 to vector<8x128xf32>
    %11 = arith.maximumf %9, %10 : vector<8x128xf32>
    %cst_10 = arith.constant dense<0.000000e+00> : vector<8x128xf32>
    %12 = tpu.matmul %11, %2, %cst_10 {dimension_numbers = #tpu.dot_dimension_numbers<[1], [0], [0], [1], [0, 0, 1, 1], [], []>} : vector<8x128xf32>, vector<128x128xf32>, vector<8x128xf32> -> vector<8x128xf32>
    %13 = vector.broadcast %5 : vector<1x128xf32> to vector<8x128xf32>
    %14 = arith.addf %12, %13 : vector<8x128xf32>
    %cst_11 = arith.constant 0.000000e+00 : f32
    %15 = vector.broadcast %cst_11 : f32 to vector<8x128xf32>
    %16 = arith.maximumf %14, %15 : vector<8x128xf32>
    %cst_12 = arith.constant dense<0.000000e+00> : vector<8x128xf32>
    %17 = tpu.matmul %16, %3, %cst_12 {dimension_numbers = #tpu.dot_dimension_numbers<[1], [0], [0], [1], [0, 0, 1, 1], [], []>} : vector<8x128xf32>, vector<128x128xf32>, vector<8x128xf32> -> vector<8x128xf32>
    %18 = vector.broadcast %6 : vector<1x128xf32> to vector<8x128xf32>
    %19 = arith.addf %17, %18 : vector<8x128xf32>
    %c0_13 = arith.constant 0 : index
    %c0_14 = arith.constant 0 : index
    %20 = vector.load %arg4[%c0_13, %c0_14] : memref<8x128xf32, #tpu.memory_space<vmem>>, vector<8x128xf32>
    tpu.vector_store %arg4[%c0_13, %c0_14], %19 {strides = array<i32>} : memref<8x128xf32, #tpu.memory_space<vmem>>, vector<8x128xf32>,
    return
  }
  func.func @transform_0(%arg0: i32) -> (i32, i32) {
    %c0_i32 = arith.constant 0 : i32
    %c0_i32_0 = arith.constant 0 : i32
    return %arg0, %c0_i32 : i32, i32
  }
  func.func @transform_1(%arg0: i32) -> (i32, i32) {
    %c0_i32 = arith.constant 0 : i32
    %c0_i32_0 = arith.constant 0 : i32
    %c0_i32_1 = arith.constant 0 : i32
    return %c0_i32, %c0_i32_0 : i32, i32
  }
  func.func @transform_2(%arg0: i32) -> (i32, i32) {
    %c0_i32 = arith.constant 0 : i32
    %c0_i32_0 = arith.constant 0 : i32
    %c0_i32_1 = arith.constant 0 : i32
    return %c0_i32, %c0_i32_0 : i32, i32
  }
  func.func @transform_3(%arg0: i32) -> (i32, i32) {
    %c0_i32 = arith.constant 0 : i32
    %c0_i32_0 = arith.constant 0 : i32
    return %arg0, %c0_i32 : i32, i32
  }
}

</mosaic_0001>

<bundles_post_ra>
// kernel: tpu_custom_call.1
= control target key start
LH: loop header
LB: loop body
LE: loop exit
PB: predicated region body
PF: predicated region fallthrough
CT: control target
= control target key end

     0   :  { %8 = vsyncpa [#allocation3], 0  ;;  %s334_s0 = inlined_call_operand.hbm [shape: f32[8,16], index: 0, kind: input, shape index: {}]   ;;  %s335_s1 = inlined_call_operand.hbm [shape: f32[272,128], index: 1, kind: input, shape index: {}]   ;;  %s336_s2 = inlined_call_operand.hbm [shape: f32[3,128], index: 2, kind: input, shape index: {}]   ;;  %s337_s3 = inlined_call_operand.hbm [shape: f32[8,128], index: 3, kind: output, shape index: {}]  }
   0x1   :  { %9 = vsyncpa [#allocation6], 0  ;;  %s26_s14 = sshll.u32 %s335_s1, 4  ;;  %s27_s14 = int_to_ptr.hbm [resolvable:$true] %s26_s14 }
   0x2   :  { %10 = vsyncpa [#allocation4], 0  ;;  %s296_s15 = smov [#allocation5]   ;;  %s16_s19 = sshll.u32 %s334_s0, 4  ;;  %s17_s19 = int_to_ptr.hbm [resolvable:$true] %s16_s19 }
   0x3   :  { %s28_s16 = sshll.u32 %s296_s15, 4  ;;  %s297_s20 = smov 128   ;;  %s29_s16 = int_to_ptr.vmem [resolvable:$true] %s28_s16 }
   0x4   :  { %s298_s21 = smov 8   ;;  %s299_s22 = smov [#allocation2]  }
   0x5   :  { %34 = dma.hbm_to_vmem [thread:$0]  %s27_s14, 4352, %s29_s16, [#allocation6], %s297_s20, %s297_s20, %s298_s21  }
   0x6   :  { %s18_s23 = sshll.u32 %s299_s22, 4  ;;  %s40_s26 = sshll.u32 %s336_s2, 4  ;;  %s19_s23 = int_to_ptr.vmem [resolvable:$true] %s18_s23  ;;  %s41_s26 = int_to_ptr.hbm [resolvable:$true] %s40_s26 }
   0x7   :  { %21 = dma.hbm_to_vmem [thread:$0]  %s17_s19, 128, %s19_s23, [#allocation3]  }
   0x8   :  { %s300_s1 = smov [#allocation7]  }
   0x9   :  { %s42_s27 = sshll.u32 %s300_s1, 4  ;;  %s43_s27 = int_to_ptr.vmem [resolvable:$true] %s42_s27 }
   0xa   :  { %45 = dma.hbm_to_vmem [thread:$0]  %s41_s26, 64, %s43_s27, [#allocation6]  }
   0xb   :  { %290 = dma.done.wait [#allocation3], 128  }
   0xc   :  { %291 = vsyncadd [#allocation3], 4294967168 }
   0xd   :  { %292 = dma.done.wait [#allocation6], 4416  }
   0xe   :  { %293 = vsyncadd [#allocation6], 4294962880  ;;  %v60_v0 = vld [vmem:[#allocation5 + $0x8] sm:$0xff]  ;;  %v59_v1 = vld [vmem:[#allocation5] sm:$0xff]  ;;  %vm97_vm0 = vcmask 130048   ;;  %s301_s0 = smov [#allocation8]  }
   0xf   :  { %115 = vmatpush.msra.mxu0 %v60_v0  ;;  %v58_v2 = vld [vmem:[#allocation2] sm:$0xff]  ;;  %v76_v3 = vld [vmem:[#allocation5 + $0x88] sm:$0xff]  ;;  %v75_v4 = vld [vmem:[#allocation5 + $0x80] sm:$0xff]  ;;  %s171_s2 = sshll.u32 %s301_s0, 4  ;;  %s173_s30 = sshll.u32 %s337_s3, 4  ;;  %s172_s2 = int_to_ptr.vmem [resolvable:$true] %s171_s2  ;;  %s174_s30 = int_to_ptr.hbm [resolvable:$true] %s173_s30 }
  0x10   :  { %123 = vmatpush.msra.mxu1 %v76_v3  ;;  %v74_v5 = vld [vmem:[#allocation5 + $0x78] sm:$0xff]  ;;  %v73_v6 = vld [vmem:[#allocation5 + $0x70] sm:$0xff]  ;;  %v72_v7 = vld [vmem:[#allocation5 + $0x68] sm:$0xff] }
  0x11   :  { %116 = vmatpush.msra.mxu0 %v59_v1  ;;  %v71_v8 = vld [vmem:[#allocation5 + $0x60] sm:$0xff]  ;;  %v70_v9 = vld [vmem:[#allocation5 + $0x58] sm:$0xff]  ;;  %v69_v10 = vld [vmem:[#allocation5 + $0x50] sm:$0xff] }
  0x12   :  { %184 = vmatmul.msk.f32.vlgmr.msra.gmra.mxu0 %vm97_vm0, %v58_v2  ;;  %124 = vmatpush.msra.mxu1 %v75_v4  ;;  %v68_v11 = vld [vmem:[#allocation5 + $0x48] sm:$0xff]  ;;  %v67_v12 = vld [vmem:[#allocation5 + $0x40] sm:$0xff]  ;;  %v66_v13 = vld [vmem:[#allocation5 + $0x38] sm:$0xff] }
  0x13   :  { %v65_v14 = vld [vmem:[#allocation5 + $0x30] sm:$0xff]  ;;  %v64_v15 = vld [vmem:[#allocation5 + $0x28] sm:$0xff]  ;;  %v63_v16 = vld [vmem:[#allocation5 + $0x20] sm:$0xff] }
  0x14   :  { %125 = vmatpush.msra.mxu1 %v74_v5  ;;  %v62_v17 = vld [vmem:[#allocation5 + $0x18] sm:$0xff]  ;;  %v61_v18 = vld [vmem:[#allocation5 + $0x10] sm:$0xff]  ;;  %v92_v19 = vld [vmem:[#allocation5 + $0x108] sm:$0xff] }
  0x15   :  { %v91_v20 = vld [vmem:[#allocation5 + $0x100] sm:$0xff]  ;;  %145 = vmatpush.msra.mxu2 %v92_v19  ;;  %v90_v21 = vld [vmem:[#allocation5 + $0xf8] sm:$0xff]  ;;  %v89_v22 = vld [vmem:[#allocation5 + $0xf0] sm:$0xff] }
  0x16   :  { %126 = vmatpush.msra.mxu1 %v73_v6  ;;  %v88_v23 = vld [vmem:[#allocation5 + $0xe8] sm:$0xff]  ;;  %v87_v24 = vld [vmem:[#allocation5 + $0xe0] sm:$0xff]  ;;  %v86_v25 = vld [vmem:[#allocation5 + $0xd8] sm:$0xff] }
  0x17   :  { %146 = vmatpush.msra.mxu2 %v91_v20  ;;  %v85_v26 = vld [vmem:[#allocation5 + $0xd0] sm:$0xff]  ;;  %v84_v27 = vld [vmem:[#allocation5 + $0xc8] sm:$0xff]  ;;  %v83_v28 = vld [vmem:[#allocation5 + $0xc0] sm:$0xff] }
  0x18   :  { %127 = vmatpush.msra.mxu1 %v72_v7  ;;  %v82_v29 = vld [vmem:[#allocation5 + $0xb8] sm:$0xff]  ;;  %v81_v30 = vld [vmem:[#allocation5 + $0xb0] sm:$0xff]  ;;  %v80_v31 = vld [vmem:[#allocation5 + $0xa8] sm:$0xff] }
  0x19   :  { %147 = vmatpush.msra.mxu2 %v90_v21  ;;  %v191_v32 = vld [vmem:[#allocation7] ss:$0 sm:$0xff]  ;;  %v79_v36 = vld [vmem:[#allocation5 + $0xa0] sm:$0xff]  ;;  %v78_v37 = vld [vmem:[#allocation5 + $0x98] sm:$0xff] }
  0x1a   :  { %128 = vmatpush.msra.mxu1 %v71_v8  ;;  %v77_v38 = vld [vmem:[#allocation5 + $0x90] sm:$0xff] }
  0x1b   :  { %148 = vmatpush.msra.mxu2 %v89_v22  ;;  %v192_v39 = vld [vmem:[#allocation7 + $0x1] ss:$0 sm:$0xff]  ;;  %v193_v43 = vld [vmem:[#allocation7 + $0x2] ss:$0 sm:$0xff] }
  0x1c   :  { %129 = vmatpush.msra.mxu1 %v70_v9 }
  0x1d   :  { %149 = vmatpush.msra.mxu2 %v88_v23 }
  0x1e   :  { %130 = vmatpush.msra.mxu1 %v69_v10 }
  0x1f   :  { %150 = vmatpush.msra.mxu2 %v87_v24 }
  0x20   :  { %131 = vmatpush.msra.mxu1 %v68_v11 }
  0x21   :  { %151 = vmatpush.msra.mxu2 %v86_v25 }
  0x22   :  { %132 = vmatpush.msra.mxu1 %v67_v12 }
  0x23   :  { %152 = vmatpush.msra.mxu2 %v85_v26 }
  0x24   :  { %133 = vmatpush.msra.mxu1 %v66_v13 }
  0x25   :  { %153 = vmatpush.msra.mxu2 %v84_v27 }
  0x26   :  { %134 = vmatpush.msra.mxu1 %v65_v14 }
  0x27   :  { %154 = vmatpush.msra.mxu2 %v83_v28 }
  0x28   :  { %135 = vmatpush.msra.mxu1 %v64_v15 }
  0x29   :  { %155 = vmatpush.msra.mxu2 %v82_v29 }
  0x2a   :  { %136 = vmatpush.msra.mxu1 %v63_v16 }
  0x2b   :  { %156 = vmatpush.msra.mxu2 %v81_v30 }
  0x2c   :  { %137 = vmatpush.msra.mxu1 %v62_v17 }
  0x2d   :  { %157 = vmatpush.msra.mxu2 %v80_v31 }
  0x2e   :  { %138 = vmatpush.msra.mxu1 %v61_v18 }
  0x2f   :  { %158 = vmatpush.msra.mxu2 %v79_v36 }
  0x31   :  { %159 = vmatpush.msra.mxu2 %v78_v37 }
  0x33   :  { %160 = vmatpush.msra.mxu2 %v77_v38 }
  0x8f   :  { %v118_v33 = vpop.f32.mrf.mxu0 }
  0x90   :  { %v119_v34 = vadd.f32 %v191_v32, %v118_v33 }
  0x92   :  { %v121_v35 = vmax.f32 %v119_v34, 0.0 }
  0x94   :  { %139 = vmatmul.f32.vlgmr.msra.gmra.mxu1 %v121_v35 }
 0x111   :  { %v140_v40 = vpop.f32.mrf.mxu1 }
 0x112   :  { %v141_v41 = vadd.f32 %v192_v39, %v140_v40 }
 0x114   :  { %v143_v42 = vmax.f32 %v141_v41, 0.0 }
 0x116   :  { %161 = vmatmul.f32.vlgmr.msra.gmra.mxu2 %v143_v42 }
 0x199   :  { %v162_v44 = vpop.f32.mrf.mxu2 }
 0x19a   :  { %v163_v45 = vadd.f32 %v193_v43, %v162_v44 }
 0x19c   :  { %165 = vst [vmem:[#allocation8] sm:$0xff] %v163_v45 }
 0x19d   :  { %176 = dma.vmem_to_hbm [thread:$0]  %s172_s2, 128, %s174_s30, [#allocation4]  }
 0x19e   :  { %294 = dma.done.wait [#allocation4], 128  }
 0x19f   :  { %295 = vsyncadd [#allocation4], 4294967168 }
 0x1a0   :  { %181 = vsyncpa [#allocation3], 1 }
 0x1a1   :  { %182 = vsyncpa [#allocation6], 1 }
 0x1a2   :  { %183 = vsyncpa [#allocation4], 1 }

</bundles_post_ra>
